<compile_context>
chip_gen: v6e
topology: v6e:2x2x1
jax: 0.10.0
libtpu: 0.0.40
codegen_flags: <defaults>
</compile_context>

<pallas_src>
import functools

import numpy as np

import jax
import jax.numpy as jnp
from jax import lax
from jax.experimental import pallas as pl
from jax.experimental.pallas import tpu as pltpu

_LANES = 128              # lane (minor) dimension of the vreg
_MAX_BLOCK_ROWS = 8192    # 8192 x 128 f32 = 4 MiB per input block
_TARGET_STEPS = 8         # aim for >= 8 grid steps (pipelining + megacore)


def _round_up(x: int, m: int) -> int:
    return ((x + m - 1) // m) * m


# ---------------------------------------------------------------------------
# Counter-based PRNG: murmur3 32-bit finalizer of (global edge index, seed).
# One hash per edge; low/high 16 bits give the two uniform draws.
# ---------------------------------------------------------------------------
def _fmix32(x):
    x = x ^ (x >> jnp.uint32(16))
    x = x * jnp.uint32(0x85EBCA6B)
    x = x ^ (x >> jnp.uint32(13))
    x = x * jnp.uint32(0xC2B2AE35)
    x = x ^ (x >> jnp.uint32(16))
    return x


def _hash32(idx_u32, seed_u32):
    return _fmix32(idx_u32 ^ (seed_u32 * jnp.uint32(0x9E3779B9))
                   ^ jnp.uint32(0x3C6EF372))


def _noisy_labels(r, idx_u32, seed_u32, pt, *, tpr_thr, tnr_thr,
                  false_below_pt, apply_tpr, apply_tnr):
    """Shared element-wise body (used inside the kernel and for the ragged tail).

    r          : bool labels (= y.bool())
    idx_u32    : global flat edge index (uint32), only needed if tpr/tnr apply
    pt         : per-edge pt, only needed if false_below_pt > 0
    """
    if apply_tpr or apply_tnr:
        h = _hash32(idx_u32, seed_u32)
        if apply_tpr:
            # r[true_mask] = rand <= tpr   (true_mask = original labels)
            u = (h & jnp.uint32(0xFFFF)).astype(jnp.int32)
            r = jnp.logical_and(r, u < jnp.int32(tpr_thr))
        if apply_tnr:
            # false_mask taken AFTER the tpr step; r[false_mask] = ~(rand <= tnr)
            # r OR (~r AND u>=thr) == r OR (u>=thr)
            u = (h >> jnp.uint32(16)).astype(jnp.int32)
            r = jnp.logical_or(r, u >= jnp.int32(tnr_thr))
    if false_below_pt > 0.0:
        # matches `r[pt < thr] = False` exactly (incl. NaN handling)
        r = jnp.logical_and(r, jnp.logical_not(pt < false_below_pt))
    return r


def _make_kernel(block_rows, use_pt, *, tpr_thr, tnr_thr, false_below_pt,
                 apply_tpr, apply_tnr):
    shape = (block_rows, _LANES)

    def kernel(seed_ref, y_ref, *rest):
        if use_pt:
            pt_ref, out_ref = rest
            pt = pt_ref[...]
        else:
            (out_ref,) = rest
            pt = None

        r = y_ref[...] != 0                       # r = data.y.bool()

        idx = None
        seed_u = None
        if apply_tpr or apply_tnr:
            # Global flat edge index of every element of this block
            # (blocking-invariant).
            row = lax.broadcasted_iota(jnp.uint32, shape, 0)
            lane = lax.broadcasted_iota(jnp.uint32, shape, 1)
            base = (pl.program_id(0).astype(jnp.uint32)
                    * jnp.uint32(block_rows * _LANES))
            idx = base + row * jnp.uint32(_LANES) + lane
            seed_u = seed_ref[0].astype(jnp.uint32)

        r = _noisy_labels(r, idx, seed_u, pt,
                          tpr_thr=tpr_thr, tnr_thr=tnr_thr,
                          false_below_pt=false_below_pt,
                          apply_tpr=apply_tpr, apply_tnr=apply_tnr)

        out_ref[...] = r.astype(jnp.int8)

    return kernel


def _pick_block_rows(rows, max_block_rows):
    """Blocks are multiples of 32 rows (int8 output tile is (32,128)); aim for
    ~_TARGET_STEPS grid steps so the DMA pipeline has work to overlap and both
    v7x TensorCores get blocks, preferring an even step count."""
    steps = max(1, min(pl.cdiv(rows, 32), _TARGET_STEPS))
    block_rows = min(max_block_rows, _round_up(pl.cdiv(rows, steps), 32))
    steps = pl.cdiv(rows, block_rows)
    if steps > 1 and steps % 2 == 1:
        cand = min(max_block_rows, _round_up(pl.cdiv(rows, steps + 1), 32))
        if pl.cdiv(rows, cand) % 2 == 0:
            block_rows = cand
    return block_rows


@functools.partial(jax.jit,
                   static_argnames=("tpr", "tnr", "false_below_pt",
                                    "max_block_rows"))
def perfect_edge_classification_i8(y, pt=None, seed=0, *, tpr=1.0, tnr=1.0,
                                   false_below_pt=0.0,
                                   max_block_rows=_MAX_BLOCK_ROWS):
    """int8 (0/1) variant — prefer this when a downstream consumer can fuse
    the final `!= 0` itself.

    Args:
      y:    (E,) ground-truth edge labels, any numeric dtype (nonzero == True).
            Narrow dtypes (int8 / bool-as-int8) minimise HBM read traffic.
      pt:   (E,) per-edge pt (float32 / bfloat16).  Only required — and only
            streamed from HBM — when false_below_pt > 0.
      seed: integer PRNG seed (different seed -> different noise realisation).
    Returns:
      int8 (E,) with values 0/1.
    """
    assert 0.0 <= tpr <= 1.0
    assert 0.0 <= tnr <= 1.0
    e = y.shape[0]
    if e == 0:
        return jnp.zeros((0,), jnp.int8)

    apply_tpr = not np.isclose(tpr, 1.0)      # same tolerance as the reference
    apply_tnr = not np.isclose(tnr, 1.0)
    use_pt = float(false_below_pt) > 0.0
    if use_pt and pt is None:
        raise ValueError("pt is required when false_below_pt > 0")

    # Pure pass-through: no kernel launch at all.
    if not (apply_tpr or apply_tnr or use_pt):
        return (y != 0).astype(jnp.int8)

    # 16-bit integer thresholds: P(u16 < thr) == rate (resolution 2^-16).
    tpr_thr = int(round(tpr * 65536))
    tnr_thr = int(round(tnr * 65536))

    seed_scalar = jnp.asarray(seed, jnp.int32)
    fbp = float(false_below_pt)

    # 128-aligned prefix -> Pallas kernel over a lane-dense (rows, 128) slab.
    # Ragged tail (< 128 edges) -> plain jnp with the same hash.  No jnp.pad
    # pre-pass; 128-aligned edge lists take the zero-copy path.
    e_aligned = (e // _LANES) * _LANES
    rows = e_aligned // _LANES

    parts = []
    if rows > 0:
        block_rows = _pick_block_rows(rows, max_block_rows)
        grid = (pl.cdiv(rows, block_rows),)
        edge_spec = pl.BlockSpec((block_rows, _LANES), lambda i: (i, 0))

        y2 = y[:e_aligned].reshape(rows, _LANES)
        inputs = [seed_scalar.reshape(1), y2]
        in_specs = [pl.BlockSpec(memory_space=pltpu.MemorySpace.SMEM),  # seed
                    edge_spec]                                          # y
        bytes_accessed = e_aligned * (y.dtype.itemsize + 1)             # y + out
        if use_pt:
            pt2 = pt[:e_aligned].reshape(rows, _LANES)
            inputs.append(pt2)
            in_specs.append(edge_spec)                                  # pt
            bytes_accessed += e_aligned * pt.dtype.itemsize

        kernel = _make_kernel(block_rows, use_pt,
                              tpr_thr=tpr_thr, tnr_thr=tnr_thr,
                              false_below_pt=fbp,
                              apply_tpr=apply_tpr, apply_tnr=apply_tnr)

        out2 = pl.pallas_call(
            kernel,
            out_shape=jax.ShapeDtypeStruct((rows, _LANES), jnp.int8),
            grid=grid,
            in_specs=in_specs,
            out_specs=edge_spec,
            compiler_params=pltpu.CompilerParams(
                # Counter-based PRNG -> blocks fully independent; lets v7x
                # shard the grid across both TensorCores.
                dimension_semantics=("parallel",)),
            cost_estimate=pl.CostEstimate(
                flops=(25 if (apply_tpr or apply_tnr) else 3) * e_aligned,
                transcendentals=0,
                bytes_accessed=bytes_accessed),
        )(*inputs)
        parts.append(out2.reshape(e_aligned))

    if e_aligned < e:
        n_tail = e - e_aligned
        idx = jnp.arange(n_tail, dtype=jnp.uint32) + jnp.uint32(e_aligned)
        r_tail = _noisy_labels(y[e_aligned:] != 0, idx,
                               seed_scalar.astype(jnp.uint32),
                               pt[e_aligned:] if use_pt else None,
                               tpr_thr=tpr_thr, tnr_thr=tnr_thr,
                               false_below_pt=fbp,
                               apply_tpr=apply_tpr, apply_tnr=apply_tnr)
        parts.append(r_tail.astype(jnp.int8))

    return parts[0] if len(parts) == 1 else jnp.concatenate(parts)


def perfect_edge_classification(y, pt=None, seed=0, *, tpr=1.0, tnr=1.0,
                                false_below_pt=0.0,
                                max_block_rows=_MAX_BLOCK_ROWS):
    """JAX/Pallas equivalent of PerfectEdgeClassification.forward -> bool (E,)."""
    return perfect_edge_classification_i8(
        y, pt, seed, tpr=tpr, tnr=tnr, false_below_pt=false_below_pt,
        max_block_rows=max_block_rows) != 0


def _reference(y, pt, seed, *, tpr=1.0, tnr=1.0, false_below_pt=0.0):
    """Pure-jnp reference using the identical counter-hash noise model."""
    return _noisy_labels(y != 0,
                         jnp.arange(y.shape[0], dtype=jnp.uint32),
                         jnp.uint32(seed), pt,
                         tpr_thr=int(round(tpr * 65536)),
                         tnr_thr=int(round(tnr * 65536)),
                         false_below_pt=float(false_below_pt),
                         apply_tpr=not np.isclose(tpr, 1.0),
                         apply_tnr=not np.isclose(tnr, 1.0))


if __name__ == "__main__":
    key = jax.random.PRNGKey(0)
    k_y, k_pt, k_y2, k_pt2 = jax.random.split(key, 4)

    # Small synthetic graph: E = 5000 edges (not a multiple of 128, so the
    # ragged-tail path is exercised too).
    E = 5000
    tpr, tnr, fbp = 0.9, 0.95, 0.5
    y = (jax.random.uniform(k_y, (E,)) < 0.4).astype(jnp.int8)    # truth labels
    pt = jax.random.uniform(k_pt, (E,), minval=0.0, maxval=2.0)   # per-edge pt

    r = perfect_edge_classification(y, pt, seed=1234, tpr=tpr, tnr=tnr,
                                    false_below_pt=fbp)
    r = jax.block_until_ready(r)
    assert r.shape == (E,) and r.dtype == jnp.bool_

    # Bit-exact vs the pure-jnp reference of the same noise model.
    r_ref = _reference(y, pt, 1234, tpr=tpr, tnr=tnr, false_below_pt=fbp)
    assert bool(jnp.all(r == r_ref))

    # Everything below the pt threshold must be False.
    assert not bool(jnp.any(jnp.logical_and(r, pt < fbp)))

    # Pure pass-through (tpr = tnr = 1, no pt cut) equals y.bool(); no kernel.
    r_exact = perfect_edge_classification(y, pt, seed=7)
    assert bool(jnp.all(jax.block_until_ready(r_exact) == (y != 0)))

    # tpr-only, pt not streamed: no originally-false edge may turn True, and
    # roughly `tpr` of the originally-true edges survive.
    r_tpr = perfect_edge_classification(y, seed=99, tpr=0.5)
    r_tpr = jax.block_until_ready(r_tpr)
    true_mask = y != 0
    assert not bool(jnp.any(jnp.logical_and(r_tpr, ~true_mask)))
    frac = float(jnp.sum(jnp.logical_and(r_tpr, true_mask))) / float(jnp.sum(true_mask))
    assert 0.3 < frac < 0.7
    assert bool(jnp.all(r_tpr == _reference(y, None, 99, tpr=0.5)))

    # Tiny (< 128 edges) input goes through the plain-jnp path and must agree
    # with the prefix of the big run (hash is keyed on the global position).
    r_small = perfect_edge_classification(y[:100], pt[:100], seed=1234,
                                          tpr=tpr, tnr=tnr, false_below_pt=fbp)
    assert bool(jnp.all(jax.block_until_ready(r_small) == r[:100]))

    # Blocking invariance: different grid decompositions (and a masked partial
    # last block) produce identical results.
    E2 = 33000
    y2 = (jax.random.uniform(k_y2, (E2,)) < 0.4).astype(jnp.int8)
    pt2 = jax.random.uniform(k_pt2, (E2,), minval=0.0, maxval=2.0)
    r_a = perfect_edge_classification(y2, pt2, seed=5, tpr=tpr, tnr=tnr,
                                      false_below_pt=fbp)
    r_b = perfect_edge_classification(y2, pt2, seed=5, tpr=tpr, tnr=tnr,
                                      false_below_pt=fbp, max_block_rows=32)
    r_a = jax.block_until_ready(r_a)
    r_b = jax.block_until_ready(r_b)
    assert bool(jnp.all(r_a == r_b))
    assert bool(jnp.all(r_a == _reference(y2, pt2, 5, tpr=tpr, tnr=tnr,
                                          false_below_pt=fbp)))

    print("KERNEL_OK")
</pallas_src>

<mosaic_0001>
module attributes {stable_mosaic.version = 11 : i64} {
  func.func @kernel(%arg0: i32, %arg1: memref<1xi32, #tpu.memory_space<smem>>, %arg2: memref<32x128xi8, #tpu.memory_space<vmem>>, %arg3: memref<32x128xf32, #tpu.memory_space<vmem>>, %arg4: memref<32x128xi8, #tpu.memory_space<vmem>>) attributes {dimension_semantics = [#tpu.dimension_semantics<parallel>], iteration_bounds = array<i64: 2>, scalar_prefetch = 0 : i64, scratch_operands = 0 : i64, tpu.core_type = #tpu.core_type<tc>, window_params = [{transform_indices = @transform_0, window_bounds = array<i64: 1>}, {transform_indices = @transform_1, window_bounds = array<i64: 32, 128>}, {transform_indices = @transform_2, window_bounds = array<i64: 32, 128>}, {transform_indices = @transform_3, window_bounds = array<i64: 32, 128>}]} {
    %c0 = arith.constant 0 : index
    %c0_0 = arith.constant 0 : index
    %0 = vector.load %arg3[%c0, %c0_0] : memref<32x128xf32, #tpu.memory_space<vmem>>, vector<32x128xf32>
    %c0_1 = arith.constant 0 : index
    %c0_2 = arith.constant 0 : index
    %1 = vector.load %arg2[%c0_1, %c0_2] : memref<32x128xi8, #tpu.memory_space<vmem>>, vector<32x128xi8>
    %c0_i8 = arith.constant 0 : i8
    %2 = vector.broadcast %c0_i8 : i8 to vector<32x128xi8>
    %3 = arith.cmpi ne, %1, %2 : vector<32x128xi8>
    %4 = tpu.iota {dimensions = array<i32: 0>} : vector<32x128xi32>
    %5 = tpu.iota {dimensions = array<i32: 1>} : vector<32x128xi32>
    %c4096_i32 = arith.constant 4096 : i32
    %6 = arith.muli %arg0, %c4096_i32 : i32
    %c128_i32 = arith.constant 128 : i32
    %7 = vector.broadcast %c128_i32 : i32 to vector<32x128xi32>
    %8 = arith.muli %4, %7 : vector<32x128xi32>
    %9 = vector.broadcast %6 : i32 to vector<32x128xi32>
    %10 = arith.addi %9, %8 : vector<32x128xi32>
    %11 = arith.addi %10, %5 : vector<32x128xi32>
    %c0_3 = arith.constant 0 : index
    %12 = memref.load %arg1[%c0_3] : memref<1xi32, #tpu.memory_space<smem>>
    %c-1640531527_i32 = arith.constant -1640531527 : i32
    %13 = arith.muli %12, %c-1640531527_i32 : i32
    %14 = vector.broadcast %13 : i32 to vector<32x128xi32>
    %15 = arith.xori %11, %14 : vector<32x128xi32>
    %c1013904242_i32 = arith.constant 1013904242 : i32
    %16 = vector.broadcast %c1013904242_i32 : i32 to vector<32x128xi32>
    %17 = arith.xori %15, %16 : vector<32x128xi32>
    %c16_i32 = arith.constant 16 : i32
    %18 = vector.broadcast %c16_i32 : i32 to vector<32x128xi32>
    %19 = arith.shrui %17, %18 : vector<32x128xi32>
    %20 = arith.xori %17, %19 : vector<32x128xi32>
    %c-2048144789_i32 = arith.constant -2048144789 : i32
    %21 = vector.broadcast %c-2048144789_i32 : i32 to vector<32x128xi32>
    %22 = arith.muli %20, %21 : vector<32x128xi32>
    %c13_i32 = arith.constant 13 : i32
    %23 = vector.broadcast %c13_i32 : i32 to vector<32x128xi32>
    %24 = arith.shrui %22, %23 : vector<32x128xi32>
    %25 = arith.xori %22, %24 : vector<32x128xi32>
    %c-1028477387_i32 = arith.constant -1028477387 : i32
    %26 = vector.broadcast %c-1028477387_i32 : i32 to vector<32x128xi32>
    %27 = arith.muli %25, %26 : vector<32x128xi32>
    %c16_i32_4 = arith.constant 16 : i32
    %28 = vector.broadcast %c16_i32_4 : i32 to vector<32x128xi32>
    %29 = arith.shrui %27, %28 : vector<32x128xi32>
    %30 = arith.xori %27, %29 : vector<32x128xi32>
    %c65535_i32 = arith.constant 65535 : i32
    %31 = vector.broadcast %c65535_i32 : i32 to vector<32x128xi32>
    %32 = arith.andi %30, %31 : vector<32x128xi32>
    %c58982_i32 = arith.constant 58982 : i32
    %33 = vector.broadcast %c58982_i32 : i32 to vector<32x128xi32>
    %34 = arith.cmpi slt, %32, %33 : vector<32x128xi32>
    %35 = arith.andi %3, %34 : vector<32x128xi1>
    %c16_i32_5 = arith.constant 16 : i32
    %36 = vector.broadcast %c16_i32_5 : i32 to vector<32x128xi32>
    %37 = arith.shrui %30, %36 : vector<32x128xi32>
    %c62259_i32 = arith.constant 62259 : i32
    %38 = vector.broadcast %c62259_i32 : i32 to vector<32x128xi32>
    %39 = arith.cmpi sge, %37, %38 : vector<32x128xi32>
    %40 = arith.ori %35, %39 : vector<32x128xi1>
    %cst = arith.constant 5.000000e-01 : f32
    %41 = vector.broadcast %cst : f32 to vector<32x128xf32>
    %42 = arith.cmpf olt, %0, %41 : vector<32x128xf32>
    %cst_6 = arith.constant dense<true> : vector<32x128xi1>
    %43 = arith.xori %42, %cst_6 : vector<32x128xi1>
    %44 = arith.andi %40, %43 : vector<32x128xi1>
    %45 = arith.extui %44 : vector<32x128xi1> to vector<32x128xi8>
    %c0_7 = arith.constant 0 : index
    %c0_8 = arith.constant 0 : index
    %46 = vector.load %arg4[%c0_7, %c0_8] : memref<32x128xi8, #tpu.memory_space<vmem>>, vector<32x128xi8>
    tpu.vector_store %arg4[%c0_7, %c0_8], %45 {strides = array<i32>} : memref<32x128xi8, #tpu.memory_space<vmem>>, vector<32x128xi8>,
    return
  }
  func.func @transform_0(%arg0: i32) -> i32 {
    %c0_i32 = arith.constant 0 : i32
    %c0_i32_0 = arith.constant 0 : i32
    return %c0_i32 : i32
  }
  func.func @transform_1(%arg0: i32) -> (i32, i32) {
    %c0_i32 = arith.constant 0 : i32
    %c0_i32_0 = arith.constant 0 : i32
    return %arg0, %c0_i32 : i32, i32
  }
  func.func @transform_2(%arg0: i32) -> (i32, i32) {
    %c0_i32 = arith.constant 0 : i32
    %c0_i32_0 = arith.constant 0 : i32
    return %arg0, %c0_i32 : i32, i32
  }
  func.func @transform_3(%arg0: i32) -> (i32, i32) {
    %c0_i32 = arith.constant 0 : i32
    %c0_i32_0 = arith.constant 0 : i32
    return %arg0, %c0_i32 : i32, i32
  }
}

</mosaic_0001>

<bundles_post_ra>
// kernel: perfect_edge_classification_i8.1
= control target key start
LH: loop header
LB: loop body
LE: loop exit
PB: predicated region body
PF: predicated region fallthrough
CT: control target
= control target key end

     0   :  { %s1042_s0 = inlined_call_operand.<no memory space> [shape: s32[1], index: 0, kind: input, shape index: {}]   ;;  %s1043_s1 = inlined_call_operand.vmem [shape: s8[39,128], index: 1, kind: input, shape index: {}]   ;;  %s1044_s2 = inlined_call_operand.vmem [shape: f32[39,128], index: 2, kind: input, shape index: {}]   ;;  %s1045_s3 = inlined_call_operand.vmem [shape: s8[39,128], index: 3, kind: output, shape index: {}]  }
   0x1   :  { %8 = sst [smem:[#allocation2]] %s1042_s0 }
   0x2   :  { %s854_s14 = smov 0   ;;  %s856_s15 = smov 0  }
   0x3   :  { %s858_s16 = smov 0  }
   0x4 LB: > { %s867_s0 = sadd.s32 4294967295, %s795_s16   ;;  %s869_s17 = sadd.s32 1, %s795_s16   ;;  %s795_s16 = sphi %s858_s16, %s1069_s16   ;;  %s791_s15 = sphi %s856_s15, %s1068_s15   ;;  %s787_s14 = sphi %s854_s14, %s1067_s14  }
   0x5   : > { %s91_s18 = ssub.s32 %s795_s16, %s869_s17  ;;  %s94_s19 = sadd.s32 1, %s791_s15 }
   0x6   : > { %p92_p0 = scmp.eq.s32.totalorder %s91_s18, 0  ;;  %p104_p1 = scmp.ne.s32.totalorder %s791_s15, %s787_s14 }
   0x7   : > { %p105_p2 = scmp.eq.s32.totalorder %s867_s0, 1  ;;  %p624_p3 = scmp.ge.s32.totalorder %s795_s16, 1 }
   0x8   : > { %s877_s20 = scalar_select %p92_p0, %s791_s15, %s94_s19  }
   0x9   : > { %p879_p4 = por %p105_p2, %p104_p1  ;;  %p166_p5 = scmp.lt.s32.totalorder %s795_s16, 3 }
   0xb   : > { %p167_p6 = pnand %p624_p3, %p166_p5 }
   0xc   : > { %s884_s22 = sshll.u32 (!%p167_p6), %s867_s0, 2  ;;  %s630_s23 = sshll.u32 (!%p167_p6), %s867_s0, 12 }
   0xd   : > { %170 = sbr.rel (%p167_p6) target bundleno = 127 (0x7f), region = 32  ;;  %s270_s24 = sld [smem:[#allocation2]] (!%p167_p6) }
   0xe   : > { %p207_p7 = scmp.lt.s32.totalorder (!%p167_p6), %s884_s22, 4  ;;  %s199_s8 = sand.u32 (!%p167_p6), 1, %s787_s14  }
   0xf   : > { %s625_s9 = sshll.u32 (!%p167_p6), %s199_s8, 3 }
  0x10   : > { %s952_s10 = scalar_lea.vmem (!%p167_p6), [#allocation3], %s625_s9  }
  0x12   : > { %v249_v0 = vlaneseq  ;;  %v261_v2 = vstv %s630_s23  ;;  %s889_s25 = scalar_select %p207_p7, %s884_s22, 4  ;;  %vm829_vm1 = vmmov 1  }
  0x13   : > { %s271_s26 = smul.u32 2654435769, %s270_s24  ;;  %s389_s11 = ssub.s32 (%p879_p4), 5, %s884_s22 }
  0x14   : > { %v250_v1 = vshrl.u32 %v249_v0, 7  ;;  %v255_v7 = vand.u32 127, %v249_v0  ;;  %s629_s27 = sshll.u32 %s889_s25, 3  ;;  %s627_s4 = sshll.u32 %s889_s25, 1 }
  0x15   : > { %v272_v18 = vstv %s271_s26  ;;  %s895_s30 = scalar_lea.vmem %s1044_s2, %s629_s27  ;;  %s909_s7 = scalar_lea.vmem %s1043_s1, %s627_s4 }
  0x16   : > { %v257_v3 = vmul.u32 128, %v250_v1  ;;  %v251_v4 = vadd.s32 8, %v250_v1  ;;  %v252_v5 = vadd.s32 16, %v250_v1  ;;  %v253_v6 = vadd.s32 24, %v250_v1  ;;  %v237_v35 = vld [vmem:[%s895_s30] sm:$0xff]  ;;  %v238_v42 = vld [vmem:[%s895_s30 + $0x8] sm:$0xff] }
  0x17   : > { %vm353_vm0 = vcmp.lt.f32.partialorder %v237_v35, 0.5  ;;  %v239_v46 = vld [vmem:[%s895_s30 + $0x10] sm:$0xff]  ;;  %vm354_vm3 = vcmp.lt.f32.partialorder %v238_v42, 0.5  ;;  %v240_v54 = vld [vmem:[%s895_s30 + $0x18] sm:$0xff]  ;;  %v241_v60 = vld [vmem:[%s909_s7] sm:$0x3] }
  0x18   : > { %v262_v8 = vadd.s32 %v261_v2, %v257_v3  ;;  %v258_v9 = vmul.u32 128, %v251_v4  ;;  %v259_v10 = vmul.u32 128, %v252_v5  ;;  %vm902_vm2 = vmxor %vm353_vm0, %vm829_vm1  ;;  %vm355_vm4 = vcmp.lt.f32.partialorder %v239_v46, 0.5  ;;  %s648_s12 = sshll.u32 (%p879_p4), %s867_s0, 3  ;;  %p390_p8 = scmp.lt.s32.totalorder (%p879_p4), %s389_s11, 4 }
  0x19   : > { %v260_v11 = vmul.u32 128, %v253_v6  ;;  %vm361_vm5 = vmpackc.low %vm902_vm2, %vm902_vm2  ;;  %vm356_vm9 = vcmp.lt.f32.partialorder %v240_v54, 0.5  ;;  %vm245_vm12 = vnez %v241_v60  ;;  %s993_s16 = scalar_lea.vmem (%p879_p4), %s1045_s3, %s648_s12  }
  0x1a   : > { %v263_v12 = vadd.s32 %v261_v2, %v258_v9  ;;  %v266_v13 = vadd.s32 %v262_v8, %v255_v7  ;;  %v264_v14 = vadd.s32 %v261_v2, %v259_v10  ;;  %vm916_vm6 = vmxor %vm354_vm3, %vm829_vm1 }
  0x1b   : > { %v265_v16 = vadd.s32 %v261_v2, %v260_v11  ;;  %vm921_vm7 = vmxor %vm355_vm4, %vm829_vm1  ;;  %v830_v11 = vmov 0  }
  0x1c   : > { %v267_v15 = vadd.s32 %v263_v12, %v255_v7  ;;  %v268_v17 = vadd.s32 %v264_v14, %v255_v7  ;;  %v273_v20 = vxor.u32 %v272_v18, %v266_v13  ;;  %vm926_vm8 = vmpackc.even %vm361_vm5, %vm361_vm5 }
  0x1d   : > { %v269_v19 = vadd.s32 %v265_v16, %v255_v7  ;;  %vm363_vm10 = vmpackc.low %vm916_vm6, %vm916_vm6  ;;  %v242_v7 = vld [vmem:[%s909_s7 + $0x2] sm:$0x3] }
  0x1e   : > { %v274_v21 = vxor.u32 %v272_v18, %v267_v15  ;;  %v275_v22 = vxor.u32 %v272_v18, %v268_v17  ;;  %v277_v24 = vxor.u32 1013904242, %v273_v20  ;;  %vm365_vm11 = vmpackc.low %vm921_vm7, %vm921_vm7  ;;  %v243_v15 = vld [vmem:[%s909_s7 + $0x4] sm:$0x3]  ;;  %v1061_v20 = vmov 0 }
  0x1f   : > { %v276_v23 = vxor.u32 %v272_v18, %v269_v19  ;;  %vm938_vm14 = vmxor %vm356_vm9, %vm829_vm1 }
  0x20   : > { %v278_v25 = vxor.u32 1013904242, %v274_v21  ;;  %v279_v26 = vxor.u32 1013904242, %v275_v22  ;;  %v281_v28 = vshrl.u32 %v277_v24, 16  ;;  %vm942_vm4 = vmpackc.even %vm363_vm10, %vm363_vm10  ;;  %vm246_vm10 = vnez %v242_v7 }
  0x21   : > { %v280_v27 = vxor.u32 1013904242, %v276_v23  ;;  %v244_v21 = vld [vmem:[%s909_s7 + $0x6] sm:$0x3] }
  0x22   : > { %v282_v29 = vshrl.u32 %v278_v25, 16  ;;  %v283_v30 = vshrl.u32 %v279_v26, 16  ;;  %v285_v32 = vxor.u32 %v281_v28, %v277_v24 }
  0x23   : > { %v284_v31 = vshrl.u32 %v280_v27, 16 }
  0x24   : > { %v286_v33 = vxor.u32 %v282_v29, %v278_v25  ;;  %v287_v34 = vxor.u32 %v283_v30, %v279_v26  ;;  %v289_v36 = vmul.u32 2246822507, %v285_v32 }
  0x25   : > { %v288_v39 = vxor.u32 %v284_v31, %v280_v27 }
  0x26   : > { %v290_v37 = vmul.u32 2246822507, %v286_v33  ;;  %v291_v38 = vmul.u32 2246822507, %v287_v34  ;;  %v293_v40 = vshrl.u32 %v289_v36, 13 }
  0x27   : > { %v292_v48 = vmul.u32 2246822507, %v288_v39 }
  0x28   : > { %v294_v41 = vshrl.u32 %v290_v37, 13  ;;  %v295_v43 = vshrl.u32 %v291_v38, 13  ;;  %v297_v44 = vxor.u32 %v293_v40, %v289_v36 }
  0x29   : > { %v296_v56 = vshrl.u32 %v292_v48, 13 }
  0x2a   : > { %v298_v45 = vxor.u32 %v294_v41, %v290_v37  ;;  %v301_v49 = vmul.u32 3266489909, %v297_v44  ;;  %v299_v51 = vxor.u32 %v295_v43, %v291_v38 }
  0x2b   : > { %v300_v1 = vxor.u32 %v296_v56, %v292_v48 }
  0x2c   : > { %v302_v50 = vmul.u32 3266489909, %v298_v45  ;;  %v305_v52 = vshrl.u32 %v301_v49, 16  ;;  %v303_v58 = vmul.u32 3266489909, %v299_v51 }
  0x2d   : > { %v304_v6 = vmul.u32 3266489909, %v300_v1 }
  0x2e   : > { %v306_v53 = vshrl.u32 %v302_v50, 16  ;;  %v309_v57 = vxor.u32 %v305_v52, %v301_v49  ;;  %v307_v2 = vshrl.u32 %v303_v58, 16 }
  0x2f   : > { %v308_v10 = vshrl.u32 %v304_v6, 16 }
  0x30   : > { %v310_v62 = vxor.u32 %v306_v53, %v302_v50  ;;  %v313_v63 = vand.u32 65535, %v309_v57  ;;  %v333_v0 = vshrl.u32 %v309_v57, 16  ;;  %v311_v9 = vxor.u32 %v307_v2, %v303_v58 }
  0x31   : > { %v312_v17 = vxor.u32 %v308_v10, %v304_v6 }
  0x32   : > { %vm317_vm13 = vcmp.lt.s32.totalorder %v313_v63, 58982  ;;  %vm337_vm0 = vcmp.ge.s32.totalorder %v333_v0, 62259  ;;  %v314_v4 = vand.u32 65535, %v310_v62  ;;  %v334_v8 = vshrl.u32 %v310_v62, 16 }
  0x33   : > { %vm321_vm15 = vmpackc.low %vm317_vm13, %vm317_vm13  ;;  %v315_v13 = vand.u32 65535, %v311_v9  ;;  %v335_v16 = vshrl.u32 %v311_v9, 16  ;;  %v316_v19 = vand.u32 65535, %v312_v17  ;;  %v336_v22 = vshrl.u32 %v312_v17, 16 }
  0x34   : > { %vm322_vm2 = vmpackc.even %vm321_vm15, %vm321_vm15  ;;  %vm318_vm1 = vcmp.lt.s32.totalorder %v314_v4, 58982 }
  0x35   : > { %vm329_vm3 = vmand %vm245_vm12, %vm322_vm2  ;;  %vm339_vm7 = vcmp.ge.s32.totalorder %v335_v16, 62259 }
  0x36   : > { %vm341_vm5 = vmpackc.low %vm337_vm0, %vm337_vm0  ;;  %vm338_vm0 = vcmp.ge.s32.totalorder %v334_v8, 62259 }
  0x37   : > { %vm342_vm6 = vmpackc.even %vm341_vm5, %vm341_vm5 }
  0x38   : > { %vm349_vm9 = vmor %vm329_vm3, %vm342_vm6 }
  0x39   : > { %vm367_vm13 = vmpackc.low %vm938_vm14, %vm938_vm14 }
  0x3a   : > { %vm369_vm12 = vmand %vm349_vm9, %vm926_vm8 }
  0x3b   : > { %v373_v12 = vsel %vm369_vm12, 16843009, %v830_v11  ;;  %vm323_vm15 = vmpackc.low %vm318_vm1, %vm318_vm1  ;;  %vm319_vm1 = vcmp.lt.s32.totalorder %v315_v13, 58982 }
  0x3c   : > { %377 = vst [vmem:[%s952_s10] sm:$0x3] %v373_v12  ;;  %vm324_vm2 = vmpackc.even %vm323_vm15, %vm323_vm15 }
  0x3d   : > { %vm330_vm3 = vmand %vm246_vm10, %vm324_vm2  ;;  %vm247_vm10 = vnez %v243_v15 }
  0x3e   : > { %vm961_vm8 = vmpackc.even %vm365_vm11, %vm365_vm11 }
  0x3f   : > { %vm343_vm5 = vmpackc.low %vm338_vm0, %vm338_vm0 }
  0x40   : > { %vm344_vm6 = vmpackc.even %vm343_vm5, %vm343_vm5  ;;  %vm320_vm5 = vcmp.lt.s32.totalorder %v316_v19, 58982 }
  0x41   : > { %vm350_vm9 = vmor %vm330_vm3, %vm344_vm6 }
  0x42   : > { %vm370_vm12 = vmand %vm350_vm9, %vm942_vm4  ;;  %vm248_vm9 = vnez %v244_v21 }
  0x43   : > { %v374_v18 = vsel %vm370_vm12, 16843009, %v830_v11  ;;  %vm325_vm15 = vmpackc.low %vm319_vm1, %vm319_vm1 }
  0x44   : > { %378 = vst [vmem:[%s952_s10 + $0x2] sm:$0x3] %v374_v18  ;;  %vm326_vm11 = vmpackc.even %vm325_vm15, %vm325_vm15 }
  0x45   : > { %vm331_vm2 = vmand %vm247_vm10, %vm326_vm11  ;;  %vm340_vm10 = vcmp.ge.s32.totalorder %v336_v22, 62259 }
  0x46   : > { %vm975_vm0 = vmpackc.even %vm367_vm13, %vm367_vm13 }
  0x47   : > { %v1062_v20 = vsel %vm975_vm0, 4294967295, %v1061_v20  ;;  %vm345_vm4 = vmpackc.low %vm339_vm7, %vm339_vm7 }
  0x48   : > { %vm346_vm3 = vmpackc.even %vm345_vm4, %vm345_vm4  ;;  %vm1063_vm7 = vnez %v1062_v20 }
  0x49   : > { %vm351_vm6 = vmor %vm331_vm2, %vm346_vm3 }
  0x4a   : > { %vm371_vm1 = vmand %vm351_vm6, %vm961_vm8 }
  0x4b   : > { %v375_v23 = vsel %vm371_vm1, 16843009, %v830_v11  ;;  %vm327_vm12 = vmpackc.low %vm320_vm5, %vm320_vm5 }
  0x4c   : > { %379 = vst [vmem:[%s952_s10 + $0x4] sm:$0x3] %v375_v23  ;;  %vm328_vm14 = vmpackc.even %vm327_vm12, %vm327_vm12 }
  0x4d   : > { %vm332_vm13 = vmand %vm248_vm9, %vm328_vm14 }
  0x4e   : > { %vm347_vm15 = vmpackc.low %vm340_vm10, %vm340_vm10 }
  0x4f   : > { %vm348_vm11 = vmpackc.even %vm347_vm15, %vm347_vm15  ;;  %387 = sbr.rel (!%p879_p4) target bundleno = 127 (0x7f), region = 36 }
  0x50   : > { %vm352_vm0 = vmor %vm332_vm13, %vm348_vm11 }
  0x51   : > { %vm372_vm4 = vmand %vm352_vm0, %vm1063_vm7 }
  0x52   : > { %v376_v24 = vsel %vm372_vm4, 16843009, %v830_v11 }
  0x53   : > { %380 = vst [vmem:[%s952_s10 + $0x6] sm:$0x3] %v376_v24 }
  0x54   : > { %s1071_s11 = smov (!%p390_p8, %s389_s11), 4 }
  0x55   : > { %s633_s18 = sshll.u32 %s1071_s11, 5 }
  0x56   : > { %p636_p9 = scmp.eq.s32.totalorder %s633_s18, 0 }
  0x57   : > { %s999_s19 = sshrl.u32 (!%p636_p9), %s1071_s11, 2 }
  0x58   : > { %398 = sbr.rel (%p636_p9) target bundleno = 127 (0x7f), region = 40  ;;  %p637_p10 = scmp.le.s32.totalorder (!%p636_p9), %s999_s19, 0 }
  0x5d   : > { %571 = sbr.rel (%p637_p10) target bundleno = 110 (0x6e), region = 115  ;;  %s1064_s0 = smov (!%p637_p10), %s993_s16 }
  0x5e   : > { %s1065_s21 = smov (!%p637_p10), %s952_s10  ;;  %s1008_s22 = smov (!%p637_p10), 0  }
  0x5f   : > { %s809_s23 = smov (!%p637_p10), 0  }
  0x62 LB: >> { %v415_v25 = vld [vmem:[%s803_s21] sm:$0x3]  ;;  %v417_v26 = vld [vmem:[%s803_s21 + $0x2] sm:$0x3]  ;;  %v419_v27 = vld [vmem:[%s803_s21 + $0x4] sm:$0x3]  ;;  %s811_s23 = sphi %s809_s23, %s409_s23   ;;  %s807_s22 = sphi %s1008_s22, %s1066_s22   ;;  %s803_s21 = sphi %s1065_s21, %s428_s21   ;;  %s799_s0 = sphi %s1064_s0, %s429_s0  }
  0x63   : >> { %416 = vst [vmem:[%s799_s0] sm:$0x3] %v415_v25  ;;  %418 = vst [vmem:[%s799_s0 + $0x2] sm:$0x3] %v417_v26  ;;  %v421_v28 = vld [vmem:[%s803_s21 + $0x6] sm:$0x3]  ;;  %s423_s24 = sadd.s32 1, %s807_s22 }
  0x64   : >> { %420 = vst [vmem:[%s799_s0 + $0x4] sm:$0x3] %v419_v27  ;;  %422 = vst [vmem:[%s799_s0 + $0x6] sm:$0x3] %v421_v28  ;;  %p424_p11 = scmp.ge.s32.totalorder %s423_s24, %s999_s19  ;;  %s409_s23 = sadd.s32 1, %s811_s23  }
  0x65   : >> { %p408_p12 = scmp.ge.s32.totalorder %s409_s23, %s999_s19 }
  0x66   : >> { %s1073_s24 = smov (%p424_p11, %s423_s24), 0 }
  0x67   : >> { %s638_s25 = sshll.u32 %s1073_s24, 3  ;;  %s1066_s22 = smov %s1073_s24 }
  0x68   : >> { %s428_s21 = scalar_lea.vmem %s952_s10, %s638_s25 [#allocation3]   ;;  %s429_s0 = scalar_lea.vmem %s993_s16, %s638_s25  }
  0x69   : > { %411 = sbr.rel (!%p408_p12) target bundleno = 98 (0x62), region = 121 }
  0x6e PF: > { %s1024_s26 = sand.u32 3, %s1071_s11   ;;  %s649_s27 = sshll.u32 %s999_s19, 3 }
  0x6f   : > { %s434_s28 = scalar_lea.vmem %s952_s10, %s649_s27 [#allocation3]   ;;  %s436_s29 = scalar_lea.vmem %s993_s16, %s649_s27  }
  0x70   : > { %p643_p13 = scmp.le.s32.totalorder %s1024_s26, 0 }
  0x71   : > { %s813_s30 = smov (!%p643_p13), %s436_s29   ;;  %s817_s4 = smov (!%p643_p13), %s434_s28  }
  0x72   : > { %585 = sbr.rel (%p643_p13) target bundleno = 127 (0x7f), region = 126  ;;  %s821_s5 = smov (!%p643_p13), 0  }
  0x73   : > { %s825_s6 = smov (!%p643_p13), 0  }
  0x77 LB: >> { %v446_v29 = vld [vmem:[%s819_s4] sm:$0x3]  ;;  %s448_s7 = sadd.s32 1, %s823_s5  ;;  %s440_s6 = sadd.s32 1, %s827_s6   ;;  %s827_s6 = sphi %s825_s6, %s440_s6   ;;  %s823_s5 = sphi %s821_s5, %s822_s5   ;;  %s819_s4 = sphi %s817_s4, %s453_s4   ;;  %s815_s30 = sphi %s813_s30, %s454_s30  }
  0x78   : >> { %447 = vst [vmem:[%s815_s30] sm:$0x3] %v446_v29  ;;  %p449_p0 = scmp.ge.s32.totalorder %s448_s7, %s1024_s26  ;;  %p439_p1 = scmp.ge.s32.totalorder %s440_s6, %s1024_s26 }
  0x7a   : >> { %s1075_s7 = smov (%p449_p0, %s448_s7), 0  ;;  %442 = sbr.rel (!%p439_p1) target bundleno = 119 (0x77), region = 132 }
  0x7b   : >> { %s644_s8 = sshll.u32 %s1075_s7, 1  ;;  %s822_s5 = smov %s1075_s7  }
  0x7c   : >> { %s453_s4 = scalar_lea.vmem %s434_s28, %s644_s8 [#allocation3]   ;;  %s454_s30 = scalar_lea.vmem %s436_s29, %s644_s8  }
  0x7f PF: > { %p11_p2 = scmp.ge.s32.totalorder %s869_s17, 4   ;;  %s1067_s14 = smov %s791_s15 }
  0x80   : > { %s1068_s15 = smov %s877_s20  ;;  %s1069_s16 = smov %s869_s17 }
  0x81   :  { %13 = sbr.rel (!%p11_p2) target bundleno = 4 (0x4), region = 143 }

</bundles_post_ra>
